<compile_context>
chip_gen: v7x
topology: tpu7x:2x2x1
jax: 0.10.0
libtpu: 0.0.40
codegen_flags: <defaults>
</compile_context>

<pallas_src>
import functools

import numpy as np

import jax
import jax.numpy as jnp
from jax import lax
from jax.experimental import pallas as pl
from jax.experimental.pallas import tpu as pltpu


def _band_conv_weight(w_dhwio, H, W):
    """Fold a (3,3,3,Ci,Co) conv kernel into 3 banded matmul weights.

    Returns float32 numpy (3, H*W*Ci, H*W*Co) with
        out[kd, ((h+kh-1)*W + (w+kw-1))*Ci + ci, (h*W + w)*Co + co]
            = w[kd, kh, kw, ci, co]
    for in-range taps; out-of-range (kh, kw) taps are omitted, which encodes
    the conv's zero padding along H and W.
    """
    w = np.asarray(jax.device_get(w_dhwio), dtype=np.float32)
    kD, kH, kW, Ci, Co = w.shape
    out = np.zeros((kD, H * W * Ci, H * W * Co), dtype=np.float32)
    for kd in range(kD):
        for kh in range(kH):
            for kw in range(kW):
                blk = w[kd, kh, kw]                       # (Ci, Co)
                for h in range(H):
                    hp = h + kh - 1
                    if hp < 0 or hp >= H:
                        continue
                    for ww in range(W):
                        wp = ww + kw - 1
                        if wp < 0 or wp >= W:
                            continue
                        r = (hp * W + wp) * Ci
                        c = (h * W + ww) * Co
                        out[kd, r:r + Ci, c:c + Co] = blk
    return out


def _simple_rb_kernel(x_ref, w1_ref, w2_ref, bn_ref, o_ref, h_ref, *, D):
    """Fused conv1+BN1+ReLU -> conv2+BN2 -> +residual -> ReLU (one batch elem).

    x_ref : (1, D+2, F) bf16, F = H*W*C; rows 0 and D+1 are zeros (D padding).
    w1_ref, w2_ref : (3, F, F) bf16 banded conv weights (one per kd tap).
    bn_ref : (4, F) f32 rows = [scale1, shift1, scale2, shift2] channel-tiled.
    o_ref  : (1, D, F) f32 output.
    h_ref  : (D+2, F) bf16 VMEM scratch for the intermediate activation
             (zero D-halo provides conv2's padding).
    """
    F = x_ref.shape[2]

    # ---- stage 1: conv1 + BN1 + ReLU -> h (stays in VMEM) ----
    acc = jnp.zeros((D, F), jnp.float32)
    for kd in range(3):
        acc = acc + jnp.dot(x_ref[0, kd:kd + D, :], w1_ref[kd],
                            preferred_element_type=jnp.float32)
    y1 = jnp.maximum(acc * bn_ref[0:1, :] + bn_ref[1:2, :], 0.0)

    h_ref[...] = jnp.zeros_like(h_ref)               # zero D-halo rows
    h_ref[1:D + 1, :] = y1.astype(jnp.bfloat16)

    # ---- stage 2: conv2 + BN2 + residual + ReLU ----
    acc2 = jnp.zeros((D, F), jnp.float32)
    for kd in range(3):
        acc2 = acc2 + jnp.dot(h_ref[kd:kd + D, :], w2_ref[kd],
                              preferred_element_type=jnp.float32)
    y2 = acc2 * bn_ref[2:3, :] + bn_ref[3:4, :]
    res = x_ref[0, 1:D + 1, :].astype(jnp.float32)    # residual from same block
    o_ref[0] = jnp.maximum(y2 + res, 0.0).astype(o_ref.dtype)


def simple_rb_forward(x_ncdhw, params):
    """Pallas implementation of SimpleRB.forward.  Input/output NCDHW (f32)."""
    N, C, D, H, W = x_ncdhw.shape
    F = H * W * C

    # NCDHW -> NDHWC, cast to bf16 for MXU-native matmuls, pad D by 1 on each
    # side and flatten (H, W, C) into a single lane-dense axis.
    x = jnp.transpose(x_ncdhw, (0, 2, 3, 4, 1)).astype(jnp.bfloat16)
    x2d = jnp.pad(x, ((0, 0), (1, 1), (0, 0), (0, 0), (0, 0))).reshape(
        N, D + 2, F)

    # One-off host-side preparation of banded weights / tiled BN params.
    # (Precompute & cache these in real use; this wrapper is not jit-traced.)
    w1b = jnp.asarray(_band_conv_weight(params["w1"], H, W), jnp.bfloat16)
    w2b = jnp.asarray(_band_conv_weight(params["w2"], H, W), jnp.bfloat16)
    bn = jnp.stack([
        jnp.tile(params["scale1"], H * W),
        jnp.tile(params["shift1"], H * W),
        jnp.tile(params["scale2"], H * W),
        jnp.tile(params["shift2"], H * W),
    ]).astype(jnp.float32)                            # (4, F)

    kernel = functools.partial(_simple_rb_kernel, D=D)
    out2d = pl.pallas_call(
        kernel,
        out_shape=jax.ShapeDtypeStruct((N, D, F), jnp.float32),
        grid=(N,),
        in_specs=[
            pl.BlockSpec((1, D + 2, F), lambda n: (n, 0, 0)),
            pl.BlockSpec((3, F, F), lambda n: (0, 0, 0)),
            pl.BlockSpec((3, F, F), lambda n: (0, 0, 0)),
            pl.BlockSpec((4, F), lambda n: (0, 0)),
        ],
        out_specs=pl.BlockSpec((1, D, F), lambda n: (n, 0, 0)),
        scratch_shapes=[pltpu.VMEM((D + 2, F), jnp.bfloat16)],
        compiler_params=pltpu.CompilerParams(
            dimension_semantics=("parallel",),
            vmem_limit_bytes=32 * 1024 * 1024),
    )(x2d, w1b, w2b, bn)

    out = out2d.reshape(N, D, H, W, C)
    return jnp.transpose(out, (0, 4, 1, 2, 3))        # -> NCDHW


def init_simple_rb_params(key, C):
    """Deterministic synthetic parameters (shapes from SimpleRB.__init__)."""
    k1, k2, k3, k4, k5, k6 = jax.random.split(key, 6)
    w1 = 0.1 * jax.random.normal(k1, (3, 3, 3, C, C), jnp.float32)  # DHWIO
    w2 = 0.1 * jax.random.normal(k2, (3, 3, 3, C, C), jnp.float32)
    gamma1 = 1.0 + 0.1 * jax.random.normal(k3, (C,), jnp.float32)
    beta1 = 0.1 * jax.random.normal(k4, (C,), jnp.float32)
    gamma2 = 1.0 + 0.1 * jax.random.normal(k5, (C,), jnp.float32)
    beta2 = 0.1 * jax.random.normal(k6, (C,), jnp.float32)
    mean1 = jnp.zeros((C,), jnp.float32); var1 = jnp.ones((C,), jnp.float32)
    mean2 = jnp.zeros((C,), jnp.float32); var2 = jnp.ones((C,), jnp.float32)
    eps = 1e-5
    scale1 = gamma1 / jnp.sqrt(var1 + eps)
    shift1 = beta1 - mean1 * scale1
    scale2 = gamma2 / jnp.sqrt(var2 + eps)
    shift2 = beta2 - mean2 * scale2
    return dict(w1=w1, scale1=scale1, shift1=shift1,
                w2=w2, scale2=scale2, shift2=shift2)


def simple_rb_reference(x_ncdhw, params):
    """Pure-JAX reference (lax conv) with matching bf16 matmul numerics."""
    dn = ('NDHWC', 'DHWIO', 'NDHWC')
    x = jnp.transpose(x_ncdhw, (0, 2, 3, 4, 1)).astype(jnp.bfloat16)
    y = lax.conv_general_dilated(x, params["w1"].astype(jnp.bfloat16),
                                 (1, 1, 1), 'SAME', dimension_numbers=dn,
                                 preferred_element_type=jnp.float32)
    y = jnp.maximum(y * params["scale1"] + params["shift1"], 0.0)
    y = y.astype(jnp.bfloat16)
    y = lax.conv_general_dilated(y, params["w2"].astype(jnp.bfloat16),
                                 (1, 1, 1), 'SAME', dimension_numbers=dn,
                                 preferred_element_type=jnp.float32)
    y = y * params["scale2"] + params["shift2"]
    out = jnp.maximum(x.astype(jnp.float32) + y, 0.0)
    return jnp.transpose(out, (0, 4, 1, 2, 3))


if __name__ == "__main__":
    key = jax.random.PRNGKey(0)
    kx, kp = jax.random.split(key)

    N, C, D, H, W = 2, 4, 8, 8, 8
    x = jax.random.normal(kx, (N, C, D, H, W), jnp.float32)   # NCDHW like torch
    params = init_simple_rb_params(kp, C)

    out = jax.block_until_ready(simple_rb_forward(x, params))
    ref = simple_rb_reference(x, params)

    assert out.shape == (N, C, D, H, W)
    err = float(jnp.max(jnp.abs(out - ref)))
    assert err < 2e-2, err   # bf16 matmul inputs, f32 accumulation/epilogue

    print("KERNEL_OK")
</pallas_src>

<mosaic_0001>
module attributes {stable_mosaic.version = 11 : i64} {
  func.func @_simple_rb_kernel(%arg0: i32, %arg1: memref<1x10x256xbf16, #tpu.memory_space<vmem>>, %arg2: memref<3x256x256xbf16, #tpu.memory_space<vmem>>, %arg3: memref<3x256x256xbf16, #tpu.memory_space<vmem>>, %arg4: memref<4x256xf32, #tpu.memory_space<vmem>>, %arg5: memref<1x8x256xf32, #tpu.memory_space<vmem>>, %arg6: memref<10x256xbf16, #tpu.memory_space<vmem>>) attributes {dimension_semantics = [#tpu.dimension_semantics<parallel>], iteration_bounds = array<i64: 2>, scalar_prefetch = 0 : i64, scratch_operands = 1 : i64, tpu.core_type = #tpu.core_type<tc>, window_params = [{transform_indices = @transform_0, window_bounds = array<i64: 1, 10, 256>}, {pipeline_mode = #tpu.pipeline_mode<synchronous>, transform_indices = @transform_1, window_bounds = array<i64: 3, 256, 256>}, {pipeline_mode = #tpu.pipeline_mode<synchronous>, transform_indices = @transform_2, window_bounds = array<i64: 3, 256, 256>}, {pipeline_mode = #tpu.pipeline_mode<synchronous>, transform_indices = @transform_3, window_bounds = array<i64: 4, 256>}, {transform_indices = @transform_4, window_bounds = array<i64: 1, 8, 256>}]} {
    %cst = arith.constant 0.000000e+00 : f32
    %0 = vector.broadcast %cst : f32 to vector<8x256xf32>
    %c0 = arith.constant 0 : index
    %c0_0 = arith.constant 0 : index
    %c0_1 = arith.constant 0 : index
    %1 = vector.load %arg1[%c0, %c0_0, %c0_1] : memref<1x10x256xbf16, #tpu.memory_space<vmem>>, vector<1x8x256xbf16>
    %2 = vector.shape_cast %1 : vector<1x8x256xbf16> to vector<8x256xbf16>
    %c0_2 = arith.constant 0 : index
    %c0_3 = arith.constant 0 : index
    %c0_4 = arith.constant 0 : index
    %3 = vector.load %arg2[%c0_2, %c0_3, %c0_4] : memref<3x256x256xbf16, #tpu.memory_space<vmem>>, vector<1x256x256xbf16>
    %4 = vector.shape_cast %3 : vector<1x256x256xbf16> to vector<256x256xbf16>
    %cst_5 = arith.constant dense<0.000000e+00> : vector<8x256xf32>
    %5 = tpu.matmul %2, %4, %cst_5 {dimension_numbers = #tpu.dot_dimension_numbers<[1], [0], [0], [1], [0, 0, 1, 1], [], []>} : vector<8x256xbf16>, vector<256x256xbf16>, vector<8x256xf32> -> vector<8x256xf32>
    %6 = arith.addf %0, %5 : vector<8x256xf32>
    %c0_6 = arith.constant 0 : index
    %c1 = arith.constant 1 : index
    %c0_7 = arith.constant 0 : index
    %7 = vector.load %arg1[%c0_6, %c1, %c0_7] : memref<1x10x256xbf16, #tpu.memory_space<vmem>>, vector<1x8x256xbf16>
    %8 = vector.shape_cast %7 : vector<1x8x256xbf16> to vector<8x256xbf16>
    %c1_8 = arith.constant 1 : index
    %c0_9 = arith.constant 0 : index
    %c0_10 = arith.constant 0 : index
    %9 = vector.load %arg2[%c1_8, %c0_9, %c0_10] : memref<3x256x256xbf16, #tpu.memory_space<vmem>>, vector<1x256x256xbf16>
    %10 = vector.shape_cast %9 : vector<1x256x256xbf16> to vector<256x256xbf16>
    %cst_11 = arith.constant dense<0.000000e+00> : vector<8x256xf32>
    %11 = tpu.matmul %8, %10, %cst_11 {dimension_numbers = #tpu.dot_dimension_numbers<[1], [0], [0], [1], [0, 0, 1, 1], [], []>} : vector<8x256xbf16>, vector<256x256xbf16>, vector<8x256xf32> -> vector<8x256xf32>
    %12 = arith.addf %6, %11 : vector<8x256xf32>
    %c0_12 = arith.constant 0 : index
    %c2 = arith.constant 2 : index
    %c0_13 = arith.constant 0 : index
    %13 = vector.load %arg1[%c0_12, %c2, %c0_13] : memref<1x10x256xbf16, #tpu.memory_space<vmem>>, vector<1x8x256xbf16>
    %14 = vector.shape_cast %13 : vector<1x8x256xbf16> to vector<8x256xbf16>
    %c2_14 = arith.constant 2 : index
    %c0_15 = arith.constant 0 : index
    %c0_16 = arith.constant 0 : index
    %15 = vector.load %arg2[%c2_14, %c0_15, %c0_16] : memref<3x256x256xbf16, #tpu.memory_space<vmem>>, vector<1x256x256xbf16>
    %16 = vector.shape_cast %15 : vector<1x256x256xbf16> to vector<256x256xbf16>
    %cst_17 = arith.constant dense<0.000000e+00> : vector<8x256xf32>
    %17 = tpu.matmul %14, %16, %cst_17 {dimension_numbers = #tpu.dot_dimension_numbers<[1], [0], [0], [1], [0, 0, 1, 1], [], []>} : vector<8x256xbf16>, vector<256x256xbf16>, vector<8x256xf32> -> vector<8x256xf32>
    %18 = arith.addf %12, %17 : vector<8x256xf32>
    %c0_18 = arith.constant 0 : index
    %c0_19 = arith.constant 0 : index
    %19 = vector.load %arg4[%c0_18, %c0_19] : memref<4x256xf32, #tpu.memory_space<vmem>>, vector<1x256xf32>
    %20 = vector.broadcast %19 : vector<1x256xf32> to vector<8x256xf32>
    %21 = arith.mulf %18, %20 : vector<8x256xf32>
    %c1_20 = arith.constant 1 : index
    %c0_21 = arith.constant 0 : index
    %22 = vector.load %arg4[%c1_20, %c0_21] : memref<4x256xf32, #tpu.memory_space<vmem>>, vector<1x256xf32>
    %23 = vector.broadcast %22 : vector<1x256xf32> to vector<8x256xf32>
    %24 = arith.addf %21, %23 : vector<8x256xf32>
    %cst_22 = arith.constant 0.000000e+00 : f32
    %25 = vector.broadcast %cst_22 : f32 to vector<8x256xf32>
    %26 = arith.maximumf %24, %25 : vector<8x256xf32>
    %cst_23 = arith.constant 0.000000e+00 : bf16
    %27 = vector.broadcast %cst_23 : bf16 to vector<10x256xbf16>
    %c0_24 = arith.constant 0 : index
    %c0_25 = arith.constant 0 : index
    %28 = vector.load %arg6[%c0_24, %c0_25] : memref<10x256xbf16, #tpu.memory_space<vmem>>, vector<10x256xbf16>
    tpu.vector_store %arg6[%c0_24, %c0_25], %27 {strides = array<i32>} : memref<10x256xbf16, #tpu.memory_space<vmem>>, vector<10x256xbf16>,
    %29 = arith.truncf %26 : vector<8x256xf32> to vector<8x256xbf16>
    %c1_26 = arith.constant 1 : index
    %c0_27 = arith.constant 0 : index
    %30 = vector.load %arg6[%c1_26, %c0_27] : memref<10x256xbf16, #tpu.memory_space<vmem>>, vector<8x256xbf16>
    tpu.vector_store %arg6[%c1_26, %c0_27], %29 {strides = array<i32>} : memref<10x256xbf16, #tpu.memory_space<vmem>>, vector<8x256xbf16>,
    %cst_28 = arith.constant 0.000000e+00 : f32
    %31 = vector.broadcast %cst_28 : f32 to vector<8x256xf32>
    %c0_29 = arith.constant 0 : index
    %c0_30 = arith.constant 0 : index
    %32 = vector.load %arg6[%c0_29, %c0_30] : memref<10x256xbf16, #tpu.memory_space<vmem>>, vector<8x256xbf16>
    %c0_31 = arith.constant 0 : index
    %c0_32 = arith.constant 0 : index
    %c0_33 = arith.constant 0 : index
    %33 = vector.load %arg3[%c0_31, %c0_32, %c0_33] : memref<3x256x256xbf16, #tpu.memory_space<vmem>>, vector<1x256x256xbf16>
    %34 = vector.shape_cast %33 : vector<1x256x256xbf16> to vector<256x256xbf16>
    %cst_34 = arith.constant dense<0.000000e+00> : vector<8x256xf32>
    %35 = tpu.matmul %32, %34, %cst_34 {dimension_numbers = #tpu.dot_dimension_numbers<[1], [0], [0], [1], [0, 0, 1, 1], [], []>} : vector<8x256xbf16>, vector<256x256xbf16>, vector<8x256xf32> -> vector<8x256xf32>
    %36 = arith.addf %31, %35 : vector<8x256xf32>
    %c1_35 = arith.constant 1 : index
    %c0_36 = arith.constant 0 : index
    %37 = vector.load %arg6[%c1_35, %c0_36] : memref<10x256xbf16, #tpu.memory_space<vmem>>, vector<8x256xbf16>
    %c1_37 = arith.constant 1 : index
    %c0_38 = arith.constant 0 : index
    %c0_39 = arith.constant 0 : index
    %38 = vector.load %arg3[%c1_37, %c0_38, %c0_39] : memref<3x256x256xbf16, #tpu.memory_space<vmem>>, vector<1x256x256xbf16>
    %39 = vector.shape_cast %38 : vector<1x256x256xbf16> to vector<256x256xbf16>
    %cst_40 = arith.constant dense<0.000000e+00> : vector<8x256xf32>
    %40 = tpu.matmul %37, %39, %cst_40 {dimension_numbers = #tpu.dot_dimension_numbers<[1], [0], [0], [1], [0, 0, 1, 1], [], []>} : vector<8x256xbf16>, vector<256x256xbf16>, vector<8x256xf32> -> vector<8x256xf32>
    %41 = arith.addf %36, %40 : vector<8x256xf32>
    %c2_41 = arith.constant 2 : index
    %c0_42 = arith.constant 0 : index
    %42 = vector.load %arg6[%c2_41, %c0_42] : memref<10x256xbf16, #tpu.memory_space<vmem>>, vector<8x256xbf16>
    %c2_43 = arith.constant 2 : index
    %c0_44 = arith.constant 0 : index
    %c0_45 = arith.constant 0 : index
    %43 = vector.load %arg3[%c2_43, %c0_44, %c0_45] : memref<3x256x256xbf16, #tpu.memory_space<vmem>>, vector<1x256x256xbf16>
    %44 = vector.shape_cast %43 : vector<1x256x256xbf16> to vector<256x256xbf16>
    %cst_46 = arith.constant dense<0.000000e+00> : vector<8x256xf32>
    %45 = tpu.matmul %42, %44, %cst_46 {dimension_numbers = #tpu.dot_dimension_numbers<[1], [0], [0], [1], [0, 0, 1, 1], [], []>} : vector<8x256xbf16>, vector<256x256xbf16>, vector<8x256xf32> -> vector<8x256xf32>
    %46 = arith.addf %41, %45 : vector<8x256xf32>
    %c2_47 = arith.constant 2 : index
    %c0_48 = arith.constant 0 : index
    %47 = vector.load %arg4[%c2_47, %c0_48] : memref<4x256xf32, #tpu.memory_space<vmem>>, vector<1x256xf32>
    %48 = vector.broadcast %47 : vector<1x256xf32> to vector<8x256xf32>
    %49 = arith.mulf %46, %48 : vector<8x256xf32>
    %c3 = arith.constant 3 : index
    %c0_49 = arith.constant 0 : index
    %50 = vector.load %arg4[%c3, %c0_49] : memref<4x256xf32, #tpu.memory_space<vmem>>, vector<1x256xf32>
    %51 = vector.broadcast %50 : vector<1x256xf32> to vector<8x256xf32>
    %52 = arith.addf %49, %51 : vector<8x256xf32>
    %c0_50 = arith.constant 0 : index
    %c1_51 = arith.constant 1 : index
    %c0_52 = arith.constant 0 : index
    %53 = vector.load %arg1[%c0_50, %c1_51, %c0_52] : memref<1x10x256xbf16, #tpu.memory_space<vmem>>, vector<1x8x256xbf16>
    %54 = vector.shape_cast %53 : vector<1x8x256xbf16> to vector<8x256xbf16>
    %55 = arith.extf %54 : vector<8x256xbf16> to vector<8x256xf32>
    %56 = arith.addf %52, %55 : vector<8x256xf32>
    %cst_53 = arith.constant 0.000000e+00 : f32
    %57 = vector.broadcast %cst_53 : f32 to vector<8x256xf32>
    %58 = arith.maximumf %56, %57 : vector<8x256xf32>
    %c0_54 = arith.constant 0 : index
    %c0_55 = arith.constant 0 : index
    %c0_56 = arith.constant 0 : index
    %59 = vector.load %arg5[%c0_54, %c0_55, %c0_56] : memref<1x8x256xf32, #tpu.memory_space<vmem>>, vector<1x8x256xf32>
    %60 = vector.shape_cast %59 : vector<1x8x256xf32> to vector<8x256xf32>
    %61 = vector.shape_cast %58 : vector<8x256xf32> to vector<1x8x256xf32>
    tpu.vector_store %arg5[%c0_54, %c0_55, %c0_56], %61 {strides = array<i32>} : memref<1x8x256xf32, #tpu.memory_space<vmem>>, vector<1x8x256xf32>,
    return
  }
  func.func @transform_0(%arg0: i32) -> (i32, i32, i32) {
    %c0_i32 = arith.constant 0 : i32
    %c0_i32_0 = arith.constant 0 : i32
    %c0_i32_1 = arith.constant 0 : i32
    return %arg0, %c0_i32, %c0_i32_0 : i32, i32, i32
  }
  func.func @transform_1(%arg0: i32) -> (i32, i32, i32) {
    %c0_i32 = arith.constant 0 : i32
    %c0_i32_0 = arith.constant 0 : i32
    %c0_i32_1 = arith.constant 0 : i32
    %c0_i32_2 = arith.constant 0 : i32
    return %c0_i32, %c0_i32_0, %c0_i32_1 : i32, i32, i32
  }
  func.func @transform_2(%arg0: i32) -> (i32, i32, i32) {
    %c0_i32 = arith.constant 0 : i32
    %c0_i32_0 = arith.constant 0 : i32
    %c0_i32_1 = arith.constant 0 : i32
    %c0_i32_2 = arith.constant 0 : i32
    return %c0_i32, %c0_i32_0, %c0_i32_1 : i32, i32, i32
  }
  func.func @transform_3(%arg0: i32) -> (i32, i32) {
    %c0_i32 = arith.constant 0 : i32
    %c0_i32_0 = arith.constant 0 : i32
    %c0_i32_1 = arith.constant 0 : i32
    return %c0_i32, %c0_i32_0 : i32, i32
  }
  func.func @transform_4(%arg0: i32) -> (i32, i32, i32) {
    %c0_i32 = arith.constant 0 : i32
    %c0_i32_0 = arith.constant 0 : i32
    %c0_i32_1 = arith.constant 0 : i32
    return %arg0, %c0_i32, %c0_i32_0 : i32, i32, i32
  }
}

</mosaic_0001>

<bundles_post_ra>
// kernel: tpu_custom_call.1
= control target key start
LH: loop header
LB: loop body
LE: loop exit
PB: predicated region body
PF: predicated region fallthrough
CT: control target
= control target key end

     0   :  { %9 = vsyncpa [#allocation4], 0  ;;  %s2945_s0 = inlined_call_operand.vmem [shape: bf16[2,10,256], index: 0, kind: input, shape index: {}]   ;;  %s2946_s1 = inlined_call_operand.hbm [shape: bf16[3,256,256], index: 1, kind: input, shape index: {}]   ;;  %s2947_s2 = inlined_call_operand.hbm [shape: bf16[3,256,256], index: 2, kind: input, shape index: {}]   ;;  %s2948_s3 = inlined_call_operand.vmem [shape: f32[4,256], index: 3, kind: input, shape index: {}]   ;;  %s2949_s4 = inlined_call_operand.hbm [shape: f32[2,8,256], index: 4, kind: output, shape index: {}]  }
   0x1   :  { %10 = vsyncpa [#allocation7], 0 }
   0x2   :  { %11 = vsyncpa [#allocation5], 0 }
   0x3   :  { %13 = vsyncpa [#allocation5 + $0x1], 0  ;;  %s2695_s15 = smov 0   ;;  %s2697_s16 = smov 0  }
   0x4   :  { %s2699_s17 = smov 0   ;;  %s2701_s18 = smov 0  }
   0x5 LB: > { %s2716_s19 = sadd.s32 4294967295, %s2662_s18   ;;  %s1934_s20 = sadd.s32 4294967294, %s2662_s18   ;;  %s2662_s18 = sphi %s2701_s18, %s2969_s18   ;;  %s2658_s17 = sphi %s2699_s17, %s2968_s17   ;;  %s2654_s16 = sphi %s2697_s16, %s2967_s16   ;;  %s2650_s15 = sphi %s2695_s15, %s2966_s15  }
   0x6   : > { %s2720_s21 = sadd.s32 1, %s2662_s18   ;;  %s115_s22 = sadd.s32 1, %s2658_s17 }
   0x7   : > { %s112_s23 = ssub.s32 %s2662_s18, %s2720_s21  ;;  %p125_p0 = scmp.ne.s32.totalorder %s2658_s17, %s2654_s16 }
   0x8   : > { %p113_p1 = scmp.eq.s32.totalorder %s112_s23, 0  ;;  %p126_p2 = scmp.eq.s32.totalorder %s2716_s19, 1 }
   0x9   : > { %p131_p3 = scmp.ne.s32.totalorder %s2654_s16, %s2650_s15  ;;  %p132_p4 = scmp.eq.s32.totalorder %s1934_s20, 1 }
   0xa   : > { %s2731_s24 = scalar_select %p113_p1, %s2658_s17, %s115_s22  }
   0xb   : > { %p2733_p5 = por %p126_p2, %p125_p0  ;;  %p2737_p6 = por %p132_p4, %p131_p3 }
   0xc   : > { %p1935_p7 = scmp.ge.s32.totalorder %s2662_s18, 1  ;;  %p139_p8 = scmp.lt.s32.totalorder %s2662_s18, 3 }
   0xd   : > { %s2953_s25 = scalar_select %p2733_p5, 1, 0 }
   0xe   : > { %s2954_s26 = scalar_select %p2737_p6, 1, 0 }
   0xf   : > { %p2950_p9 = scmp.eq.s32.totalorder %s2716_s19, 0  ;;  %p2744_p10 = pnand %p1935_p7, %p139_p8 }
  0x10   : > { %s2664_s28 = smov [#allocation3]   ;;  %s2665_s5 = smov [#allocation6]  }
  0x11   : > { %s2955_s27 = scalar_select %p2744_p10, 1, 0 }
  0x12   : > { %s151_s29 = sshll.u32 %s2664_s28, 4  ;;  %p2187_p11 = pneg %p2744_p10  ;;  %s152_s29 = int_to_ptr.vmem [resolvable:$true] %s151_s29 }
  0x13   : > { %s164_s6 = sshll.u32 %s2665_s5, 4  ;;  %s2536_s9 = scalar_lea.hbm %s2946_s1, 12288  ;;  %s2756_s6 = int_to_ptr.vmem [resolvable:$true] %s164_s6 }
  0x14   : > { %p2752_p12 = pnand %p2950_p9, %p2187_p11  ;;  %p2537_p13 = scmp.ne.s32.totalorder %s2946_s1, %s2536_s9 }
  0x15   : > { %p2543_p3 = scmp.lt.u32.totalorder %s2536_s9, %s2946_s1 }
  0x16   : > { %p2538_p0 = pneg %p2752_p12 }
  0x18   : > { %p2539_p1 = pnand %p2538_p0, %p2537_p13 }
  0x1a   : > { %p2540_p2 = pneg %p2539_p1 }
  0x1c   : > { %p2545_p4 = pnand %p2543_p3, %p2540_p2 }
  0x1e   : > { %2548 = shalt.err (!%p2545_p4)
}
  0x1f   : > { %s2549_s14 = scalar_lea.vmem %s152_s29, 12288  ;;  %p2557_p9 = scmp.lt.s32.totalorder %s152_s29, %s152_s29 }
  0x20   : > { %p2550_p7 = scmp.ne.s32.totalorder %s152_s29, %s2549_s14  ;;  %p2558_p6 = scmp.lt.s32.totalorder %s2549_s14, %s2549_s14 }
  0x22   : > { %p2552_p8 = pnand %p2550_p7, %p2538_p0  ;;  %p2559_p5 = por %p2558_p6, %p2557_p9 }
  0x24   : > { %p2553_p11 = pneg %p2552_p8 }
  0x26   : > { %p2560_p10 = pnand %p2559_p5, %p2553_p11 }
  0x28   : > { %2563 = shalt.err (!%p2560_p10)
}
  0x29   : > { %s2666_s20 = smov 128   ;;  %s2667_s22 = smov 8  }
  0x2a   : > { %2190 = dma.hbm_to_vmem [thread:$0]  (!%p2752_p12), %s2946_s1, 12288, %s152_s29, [#allocation4], %s2666_s20, %s2666_s20, %s2667_s22  }
  0x2b   : > { %s2564_s8 = scalar_lea.hbm %s2947_s2, 12288 }
  0x2c   : > { %p2565_p13 = scmp.ne.s32.totalorder %s2947_s2, %s2564_s8  ;;  %p2571_p9 = scmp.lt.u32.totalorder %s2564_s8, %s2947_s2 }
  0x2e   : > { %p2567_p5 = pnand %p2565_p13, %p2538_p0 }
  0x30   : > { %p2568_p6 = pneg %p2567_p5 }
  0x32   : > { %p2573_p10 = pnand %p2571_p9, %p2568_p6 }
  0x34   : > { %2576 = shalt.err (!%p2573_p10)
}
  0x35   : > { %s2577_s29 = scalar_lea.vmem %s2756_s6, 12288  ;;  %p2585_p4 = scmp.lt.s32.totalorder %s2756_s6, %s2756_s6 }
  0x36   : > { %p2578_p1 = scmp.ne.s32.totalorder %s2756_s6, %s2577_s29  ;;  %p2586_p7 = scmp.lt.s32.totalorder %s2577_s29, %s2577_s29 }
  0x38   : > { %p2580_p2 = pnand %p2578_p1, %p2538_p0  ;;  %p2587_p8 = por %p2586_p7, %p2585_p4 }
  0x3a   : > { %p2581_p3 = pneg %p2580_p2 }
  0x3c   : > { %p2588_p11 = pnand %p2587_p8, %p2581_p3 }
  0x3e   : > { %2591 = shalt.err (!%p2588_p11)
}
  0x3f   : > { %2193 = dma.hbm_to_vmem [thread:$0]  (!%p2752_p12), %s2947_s2, 12288, %s2756_s6, [#allocation7], %s2666_s20, %s2666_s20, %s2667_s22  }
  0x40   : > { %p2957_p13 = scmp.ne.s32.totalorder %s2955_s27, 0 }
  0x41   : > { %p2958_p5 = scmp.eq.s32.totalorder (!%p2957_p13), %s2716_s19, 0 }
  0x42   : > { %191 = sbr.rel (%p2957_p13) target bundleno = 879 (0x36f), region = 36 }
  0x49   : > { %2637 = dma.done.wait (%p2958_p5), [#allocation4], 12288   ;;  %p2959_p0 = pmov %p2958_p5 }
  0x4b   : > { %2639 = vsyncadd (%p2959_p0), [#allocation4], 4294955008  ;;  %p2960_p6 = pmov %p2959_p0 }
  0x4c   : > { %p2961_p9 = pmov %p2959_p0 }
  0x4d   : > { %2641 = dma.done.wait (%p2960_p6), [#allocation7], 12288  }
  0x4e   : > { %2643 = vsyncadd (%p2961_p9), [#allocation7], 4294955008  ;;  %v2240_v0 = vld [vmem:[#allocation3 + $0x104] ss:$8 sps:$4 sm:$0xff]   ;;  %v2242_v1 = vld [vmem:[#allocation3 + $0x100] ss:$8 sps:$4 sm:$0xff]  }
  0x4f   : > { %478 = vmatprep.subr.bf16.mxu0 %v2240_v0  ;;  %v2243_v2 = vld [vmem:[#allocation3 + $0x114] ss:$8 sps:$4 sm:$0xff]   ;;  %v2245_v3 = vld [vmem:[#allocation3 + $0x110] ss:$8 sps:$4 sm:$0xff]   ;;  %v2246_v4 = vld [vmem:[#allocation3 + $0x124] ss:$8 sps:$4 sm:$0xff]  }
  0x50   : > { %479 = vmatpush1.bf16.msra.mxu0 %v2242_v1  ;;  %v2248_v5 = vld [vmem:[#allocation3 + $0x120] ss:$8 sps:$4 sm:$0xff]   ;;  %p221_p12 = scmp.lt.s32.totalorder %s2716_s19, 1  ;;  %v2249_v6 = vld [vmem:[#allocation3 + $0x134] ss:$8 sps:$4 sm:$0xff]   ;;  %vm1020_vm0 = vcmask 1043456  }
  0x51   : > { %480 = vmatprep.subr.bf16.mxu0 %v2243_v2  ;;  %v2251_v7 = vld [vmem:[#allocation3 + $0x130] ss:$8 sps:$4 sm:$0xff]   ;;  %v2252_v8 = vld [vmem:[#allocation3 + $0x144] ss:$8 sps:$4 sm:$0xff]   ;;  %v2254_v9 = vld [vmem:[#allocation3 + $0x140] ss:$8 sps:$4 sm:$0xff]  }
  0x52   : > { %s222_s27 = scalar_select %p221_p12, %s2716_s19, 1  ;;  %v2255_v10 = vld [vmem:[#allocation3 + $0x154] ss:$8 sps:$4 sm:$0xff]   ;;  %v2257_v11 = vld [vmem:[#allocation3 + $0x150] ss:$8 sps:$4 sm:$0xff]   ;;  %vm1023_vm2 = vcmask 1047556  }
  0x53   : > { %v2258_v12 = vld [vmem:[#allocation3 + $0x164] ss:$8 sps:$4 sm:$0xff]   ;;  %v2260_v16 = vld [vmem:[#allocation3 + $0x160] ss:$8 sps:$4 sm:$0xff]   ;;  %v2261_v17 = vld [vmem:[#allocation3 + $0x174] ss:$8 sps:$4 sm:$0xff]  }
  0x54   : > { %481 = vmatpush1.bf16.msra.mxu0 %v2245_v3  ;;  %s2158_s30 = sshll.u32 %s222_s27, 4  ;;  %v2263_v21 = vld [vmem:[#allocation3 + $0x170] ss:$8 sps:$4 sm:$0xff]   ;;  %v2264_v22 = vld [vmem:[#allocation3 + $0x184] ss:$8 sps:$4 sm:$0xff]   ;;  %vm1030_vm4 = vcmask 1040384  }
  0x55   : > { %482 = vmatprep.subr.bf16.mxu0 %v2246_v4  ;;  %s2820_s22 = scalar_lea.vmem %s2945_s0, %s2158_s30  ;;  %v2266_v24 = vld [vmem:[#allocation3 + $0x180] ss:$8 sps:$4 sm:$0xff]   ;;  %v2267_v25 = vld [vmem:[#allocation3 + $0x194] ss:$8 sps:$4 sm:$0xff]   ;;  %v2269_v26 = vld [vmem:[#allocation3 + $0x190] ss:$8 sps:$4 sm:$0xff]  }
  0x56   : > { %v2823_v13 = vld [vmem:[%s2820_s22] sm:$0xff]  ;;  %v2826_v14 = vld [vmem:[%s2820_s22 + $0x8] sm:$0x11]  ;;  %v2270_v27 = vld [vmem:[#allocation3 + $0x1a4] ss:$8 sps:$4 sm:$0xff]   ;;  %vm1033_vm7 = vcmask 1044484  }
  0x57   : > { %v1946_v15 = vcombine.high %v2823_v13, %v2826_v14  ;;  %v2272_v28 = vld [vmem:[#allocation3 + $0x1a0] ss:$8 sps:$4 sm:$0xff]   ;;  %v2273_v29 = vld [vmem:[#allocation3 + $0x1b4] ss:$8 sps:$4 sm:$0xff]   ;;  %v2275_v30 = vld [vmem:[#allocation3 + $0x1b0] ss:$8 sps:$4 sm:$0xff]   ;;  %v1945_v34 = vcombine.low %v2823_v13, %v2826_v14  ;;  %v1980_v46 = vcombine.high %v2823_v13, %v2823_v13 }
  0x58   : > { %483 = vmatpush1.bf16.msra.mxu0 %v2248_v5  ;;  %v2276_v31 = vld [vmem:[#allocation3 + $0x1c4] ss:$8 sps:$4 sm:$0xff]   ;;  %v2278_v32 = vld [vmem:[#allocation3 + $0x1c0] ss:$8 sps:$4 sm:$0xff]   ;;  %v2279_v33 = vld [vmem:[#allocation3 + $0x1d4] ss:$8 sps:$4 sm:$0xff]  }
  0x59   : > { %484 = vmatprep.subr.bf16.mxu0 %v2249_v6  ;;  %v310_v18 = vshrl.u32 %v1946_v15, 16  ;;  %v312_v19 = vshll.u32 %v1946_v15, 16  ;;  %v2281_v35 = vld [vmem:[#allocation3 + $0x1d0] ss:$8 sps:$4 sm:$0xff]   ;;  %v2282_v36 = vld [vmem:[#allocation3 + $0x1e4] ss:$8 sps:$4 sm:$0xff]  }
  0x5a   : > { %v305_v37 = vshll.u32 %v1945_v34, 16  ;;  %v2284_v38 = vld [vmem:[#allocation3 + $0x1e0] ss:$8 sps:$4 sm:$0xff]   ;;  %v2285_v39 = vld [vmem:[#allocation3 + $0x1f4] ss:$8 sps:$4 sm:$0xff]   ;;  %v303_v40 = vshrl.u32 %v1945_v34, 16  ;;  %v1979_v34 = vcombine.low %v2823_v13, %v2823_v13 }
  0x5b   : > { %v314_v20 = vrot.slane %v312_v19, 1  ;;  %v2287_v42 = vld [vmem:[#allocation3 + $0x1f0] ss:$8 sps:$4 sm:$0xff]   ;;  %v2291_v43 = vld [vmem:[#allocation3 + $0x4] ss:$8 sps:$4 sm:$0xff]   ;;  %s218_s12 = sand.u32 1, %s2654_s16  }
  0x5c   : > { %485 = vmatpush1.bf16.msra.mxu0 %v2251_v7  ;;  %v307_v41 = vrot.slane %v305_v37, 1  ;;  %v2289_v45 = vld [vmem:[#allocation3] ss:$8 sps:$4 sm:$0xff]   ;;  %v2295_v47 = vld [vmem:[#allocation3 + $0x14] ss:$8 sps:$4 sm:$0xff]   ;;  %vm1823_vm14 = vcmask 1046528  }
  0x5d   : > { %486 = vmatprep.subr.bf16.mxu0 %v2252_v8  ;;  %v315_v23 = vor.u32 %v314_v20, %v310_v18  ;;  %v2293_v48 = vld [vmem:[#allocation3 + $0x10] ss:$8 sps:$4 sm:$0xff]   ;;  %v2390_v49 = vld [vmem:[#allocation6 + $0x104] ss:$8 sps:$4 sm:$0xff]   ;;  %v2392_v50 = vld [vmem:[#allocation6 + $0x100] ss:$8 sps:$4 sm:$0xff]  }
  0x5e   : > { %v308_v44 = vor.u32 %v307_v41, %v303_v40  ;;  %v2298_v51 = vld [vmem:[#allocation3 + $0x24] ss:$8 sps:$4 sm:$0xff]   ;;  %1291 = vmatprep.subr.bf16.mxu1 %v2390_v49  ;;  %v2393_v52 = vld [vmem:[#allocation6 + $0x114] ss:$8 sps:$4 sm:$0xff]   ;;  %v2395_v53 = vld [vmem:[#allocation6 + $0x110] ss:$8 sps:$4 sm:$0xff]  }
  0x5f   : > { %510 = vmatprep.mubr.bf16.mxu0 %v315_v23  ;;  %1292 = vmatpush1.bf16.msra.mxu1 %v2392_v50  ;;  %v2396_v54 = vld [vmem:[#allocation6 + $0x124] ss:$8 sps:$4 sm:$0xff]   ;;  %v2296_v55 = vld [vmem:[#allocation3 + $0x20] ss:$8 sps:$4 sm:$0xff]   ;;  %v2301_v56 = vld [vmem:[#allocation3 + $0x34] ss:$8 sps:$4 sm:$0xff]  }
  0x60   : > { %487 = vmatpush1.bf16.msra.mxu0 %v2254_v9  ;;  %1293 = vmatprep.subr.bf16.mxu1 %v2393_v52  ;;  %v2398_v57 = vld [vmem:[#allocation6 + $0x120] ss:$8 sps:$4 sm:$0xff]   ;;  %v2399_v58 = vld [vmem:[#allocation6 + $0x134] ss:$8 sps:$4 sm:$0xff]   ;;  %v2299_v59 = vld [vmem:[#allocation3 + $0x30] ss:$8 sps:$4 sm:$0xff]  }
  0x61   : > { %488 = vmatprep.subr.bf16.mxu0 %v2255_v10  ;;  %v2304_v60 = vld [vmem:[#allocation3 + $0x44] ss:$8 sps:$4 sm:$0xff]   ;;  %v2401_v61 = vld [vmem:[#allocation6 + $0x130] ss:$8 sps:$4 sm:$0xff]   ;;  %v2302_v63 = vld [vmem:[#allocation3 + $0x40] ss:$8 sps:$4 sm:$0xff]  }
  0x62   : > { %v2402_v62 = vld [vmem:[#allocation6 + $0x144] ss:$8 sps:$4 sm:$0xff]   ;;  %v2307_v0 = vld [vmem:[#allocation3 + $0x54] ss:$8 sps:$4 sm:$0xff]   ;;  %v2404_v1 = vld [vmem:[#allocation6 + $0x140] ss:$8 sps:$4 sm:$0xff]  }
  0x63   : > { %1294 = vmatpush1.bf16.msra.mxu1 %v2395_v53  ;;  %v2405_v2 = vld [vmem:[#allocation6 + $0x154] ss:$8 sps:$4 sm:$0xff]   ;;  %v2305_v3 = vld [vmem:[#allocation3 + $0x50] ss:$8 sps:$4 sm:$0xff]   ;;  %v2310_v4 = vld [vmem:[#allocation3 + $0x64] ss:$8 sps:$4 sm:$0xff]  }
  0x64   : > { %489 = vmatpush1.bf16.msra.mxu0 %v2257_v11  ;;  %1295 = vmatprep.subr.bf16.mxu1 %v2396_v54  ;;  %v2407_v5 = vld [vmem:[#allocation6 + $0x150] ss:$8 sps:$4 sm:$0xff]   ;;  %v2408_v6 = vld [vmem:[#allocation6 + $0x164] ss:$8 sps:$4 sm:$0xff]   ;;  %v2308_v7 = vld [vmem:[#allocation3 + $0x60] ss:$8 sps:$4 sm:$0xff]  }
  0x65   : > { %490 = vmatprep.subr.bf16.mxu0 %v2258_v12  ;;  %v2313_v8 = vld [vmem:[#allocation3 + $0x74] ss:$8 sps:$4 sm:$0xff]   ;;  %v2410_v9 = vld [vmem:[#allocation6 + $0x160] ss:$8 sps:$4 sm:$0xff]   ;;  %v2311_v11 = vld [vmem:[#allocation3 + $0x70] ss:$8 sps:$4 sm:$0xff]  }
  0x66   : > { %v2411_v10 = vld [vmem:[#allocation6 + $0x174] ss:$8 sps:$4 sm:$0xff]   ;;  %v2316_v12 = vld [vmem:[#allocation3 + $0x84] ss:$8 sps:$4 sm:$0xff]   ;;  %v2413_v15 = vld [vmem:[#allocation6 + $0x170] ss:$8 sps:$4 sm:$0xff]  }
  0x67   : > { %1296 = vmatpush1.bf16.msra.mxu1 %v2398_v57  ;;  %v2317_v18 = vld [vmem:[#allocation3 + $0x90] ss:$8 sps:$4 sm:$0xff]   ;;  %v2322_v19 = vld [vmem:[#allocation3 + $0xa4] ss:$8 sps:$4 sm:$0xff]   ;;  %v2320_v20 = vld [vmem:[#allocation3 + $0xa0] ss:$8 sps:$4 sm:$0xff]  }
  0x68   : > { %491 = vmatpush1.bf16.msra.mxu0 %v2260_v16  ;;  %1297 = vmatprep.subr.bf16.mxu1 %v2399_v58  ;;  %v2314_v16 = vld [vmem:[#allocation3 + $0x80] ss:$8 sps:$4 sm:$0xff]   ;;  %v2328_v23 = vld [vmem:[#allocation3 + $0xc4] ss:$8 sps:$4 sm:$0xff]   ;;  %v2345_v37 = vld [vmem:[#allocation3 + $0x214] ss:$8 sps:$4 sm:$0xff]  }
  0x69   : > { %492 = vmatprep.subr.bf16.mxu0 %v2261_v17  ;;  %v2319_v17 = vld [vmem:[#allocation3 + $0x94] ss:$8 sps:$4 sm:$0xff]   ;;  %v2346_v40 = vld [vmem:[#allocation3 + $0x220] ss:$8 sps:$4 sm:$0xff]   ;;  %v2361_v49 = vld [vmem:[#allocation3 + $0x270] ss:$8 sps:$4 sm:$0xff]  }
  0x6a   : > { %v2351_v41 = vld [vmem:[#allocation3 + $0x234] ss:$8 sps:$4 sm:$0xff]   ;;  %v2352_v13 = vld [vmem:[#allocation3 + $0x240] ss:$8 sps:$4 sm:$0xff]   ;;  %v2366_v50 = vld [vmem:[#allocation3 + $0x284] ss:$8 sps:$4 sm:$0xff]  }
  0x6b   : > { %1298 = vmatpush1.bf16.msra.mxu1 %v2401_v61  ;;  %v2369_v52 = vld [vmem:[#allocation3 + $0x294] ss:$8 sps:$4 sm:$0xff]   ;;  %v2367_v53 = vld [vmem:[#allocation3 + $0x290] ss:$8 sps:$4 sm:$0xff]   ;;  %v2372_v54 = vld [vmem:[#allocation3 + $0x2a4] ss:$8 sps:$4 sm:$0xff]  }
  0x6c   : > { %493 = vmatpush1.bf16.msra.mxu0 %v2263_v21  ;;  %1299 = vmatprep.subr.bf16.mxu1 %v2402_v62  ;;  %v2325_v21 = vld [vmem:[#allocation3 + $0xb4] ss:$8 sps:$4 sm:$0xff]   ;;  %v2373_v57 = vld [vmem:[#allocation3 + $0x2b0] ss:$8 sps:$4 sm:$0xff]   ;;  %v2378_v58 = vld [vmem:[#allocation3 + $0x2c4] ss:$8 sps:$4 sm:$0xff]  }
  0x6d   : > { %494 = vmatprep.subr.bf16.mxu0 %v2264_v22  ;;  %v2323_v22 = vld [vmem:[#allocation3 + $0xb0] ss:$8 sps:$4 sm:$0xff]   ;;  %v2384_v62 = vld [vmem:[#allocation3 + $0x2e4] ss:$8 sps:$4 sm:$0xff]   ;;  %vm1021_vm1 = vsmask.f32 7938 }
  0x6e   : > { %v2379_v61 = vld [vmem:[#allocation3 + $0x2d0] ss:$8 sps:$4 sm:$0xff]   ;;  %vm1024_vm3 = vsmask.f32 7954  ;;  %vm1031_vm5 = vsmask.f32 256  ;;  %vm2857_vm6 = vmand %vm1020_vm0, %vm1021_vm1 }
  0x6f   : > { %1300 = vmatpush1.bf16.msra.mxu1 %v2404_v1  ;;  %vm1034_vm8 = vsmask.f32 4352  ;;  %vm1025_vm9 = vmand %vm1023_vm2, %vm1024_vm3  ;;  %s1942_s29 = sshll.u32 %s218_s12, 4  ;;  %s2160_s13 = sshll.u32 %s2716_s19, 8 }
  0x70   : > { %495 = vmatpush1.bf16.msra.mxu0 %v2266_v24  ;;  %1301 = vmatprep.subr.bf16.mxu1 %v2405_v2  ;;  %v2326_v24 = vld [vmem:[#allocation3 + $0xc0] ss:$8 sps:$4 sm:$0xff]   ;;  %v2385_v2 = vld [vmem:[#allocation3 + $0x2f0] ss:$8 sps:$4 sm:$0xff]   ;;  %vm1032_vm10 = vmand %vm1030_vm4, %vm1031_vm5  ;;  %s220_s14 = scalar_lea.vmem [#allocation8], %s1942_s29  ;;  %s2901_s20 = scalar_lea.hbm %s2949_s4, %s2160_s13 }
  0x71   : > { %496 = vmatprep.subr.bf16.mxu0 %v2267_v25  ;;  %v2331_v25 = vld [vmem:[#allocation3 + $0xd4] ss:$8 sps:$4 sm:$0xff]   ;;  %vm1035_vm11 = vmand %vm1033_vm7, %vm1034_vm8  ;;  %s1853_s27 = sshll.u32 %s220_s14, 4  ;;  %p2964_p1 = scmp.ne.s32.totalorder %s2953_s25, 0  ;;  %s2903_s27 = int_to_ptr.vmem [resolvable:$true] %s1853_s27 }
  0x72   : > { %vm1026_vm12 = vmor %vm1025_vm9, %vm2857_vm6  ;;  %s2592_s19 = scalar_lea.vmem %s2903_s27, 256  ;;  %s2669_s23 = smov [#allocation8]  }
  0x73   : > { %1302 = vmatpush1.bf16.msra.mxu1 %v2407_v5  ;;  %v2416_v5 = vld [vmem:[#allocation6 + $0x180] ss:$8 sps:$4 sm:$0xff]   ;;  %vm1036_vm13 = vmor %vm1035_vm11, %vm1032_vm10  ;;  %p2593_p10 = scmp.ne.s32.totalorder %s2903_s27, %s2592_s19  ;;  %s2596_s28 = sshll.u32 %s2669_s23, 4  ;;  %s2597_s28 = int_to_ptr.vmem [resolvable:$false] %s2596_s28 }
  0x74   : > { %497 = vmatpush1.bf16.msra.mxu0 %v2269_v26  ;;  %1303 = vmatprep.subr.bf16.mxu1 %v2408_v6  ;;  %v2329_v26 = vld [vmem:[#allocation3 + $0xd0] ss:$8 sps:$4 sm:$0xff]   ;;  %v2417_v6 = vld [vmem:[#allocation6 + $0x194] ss:$8 sps:$4 sm:$0xff]   ;;  %s2598_s5 = scalar_lea.vmem %s2597_s28, 512  ;;  %p2599_p4 = scmp.lt.s32.totalorder %s2903_s27, %s2597_s28 }
  0x75   : > { %498 = vmatprep.subr.bf16.mxu0 %v2270_v27  ;;  %v2334_v27 = vld [vmem:[#allocation3 + $0xe4] ss:$8 sps:$4 sm:$0xff]   ;;  %p2594_p2 = pnand %p2593_p10, %p2964_p1  ;;  %p2600_p7 = scmp.lt.s32.totalorder %s2598_s5, %s2592_s19 }
  0x77   : > { %1304 = vmatpush1.bf16.msra.mxu1 %v2410_v9  ;;  %v2420_v9 = vld [vmem:[#allocation6 + $0x1a4] ss:$8 sps:$4 sm:$0xff]   ;;  %p2595_p3 = pneg %p2594_p2  ;;  %p2601_p8 = por %p2600_p7, %p2599_p4 }
  0x78   : > { %499 = vmatpush1.bf16.msra.mxu0 %v2272_v28  ;;  %1305 = vmatprep.subr.bf16.mxu1 %v2411_v10  ;;  %v2332_v28 = vld [vmem:[#allocation3 + $0xe0] ss:$8 sps:$4 sm:$0xff]  }
  0x79   : > { %500 = vmatprep.subr.bf16.mxu0 %v2273_v29  ;;  %v2337_v29 = vld [vmem:[#allocation3 + $0xf4] ss:$8 sps:$4 sm:$0xff]   ;;  %v2422_v10 = vld [vmem:[#allocation6 + $0x1a0] ss:$8 sps:$4 sm:$0xff]   ;;  %p2602_p11 = pnand %p2601_p8, %p2595_p3 }
  0x7b   : > { %1306 = vmatpush1.bf16.msra.mxu1 %v2413_v15  ;;  %v2428_v15 = vld [vmem:[#allocation6 + $0x1c0] ss:$8 sps:$4 sm:$0xff]  }
  0x7c   : > { %501 = vmatpush1.bf16.msra.mxu0 %v2275_v30  ;;  %v2835_v30 = vld [vmem:[%s2820_s22] sm:$0xee] }
  0x7d   : > { %502 = vmatprep.subr.bf16.mxu0 %v2276_v31  ;;  %v2335_v31 = vld [vmem:[#allocation3 + $0xf0] ss:$8 sps:$4 sm:$0xff]   ;;  %v2013_v1 = vcombine.low %v2835_v30, %v2826_v14 }
  0x80   : > { %503 = vmatpush1.bf16.msra.mxu0 %v2278_v32  ;;  %v2014_v32 = vcombine.high %v2835_v30, %v2826_v14  ;;  %v2423_v14 = vld [vmem:[#allocation6 + $0x1b4] ss:$8 sps:$4 sm:$0xff]  }
  0x81   : > { %504 = vmatprep.subr.bf16.mxu0 %v2279_v33  ;;  %v2341_v33 = vld [vmem:[#allocation3 + $0x204] ss:$8 sps:$4 sm:$0xff]  }
  0x84   : > { %505 = vmatpush1.bf16.msra.mxu0 %v2281_v35  ;;  %v2339_v35 = vld [vmem:[#allocation3 + $0x200] ss:$8 sps:$4 sm:$0xff]  }
  0x85   : > { %506 = vmatprep.subr.bf16.mxu0 %v2282_v36  ;;  %v764_v36 = vrot.slane %v2014_v32, 1 }
  0x88   : > { %507 = vmatpush1.bf16.msra.mxu0 %v2284_v38  ;;  %v2343_v38 = vld [vmem:[#allocation3 + $0x210] ss:$8 sps:$4 sm:$0xff]  }
  0x89   : > { %508 = vmatprep.subr.bf16.mxu0 %v2285_v39  ;;  %v2348_v39 = vld [vmem:[#allocation3 + $0x224] ss:$8 sps:$4 sm:$0xff]  }
  0x8c   : > { %509 = vmatpush1.bf16.msra.mxu0 %v2287_v42  ;;  %v2349_v42 = vld [vmem:[#allocation3 + $0x230] ss:$8 sps:$4 sm:$0xff]  }
  0x8d   : > { %683 = vmatprep.subr.bf16.mxu0 %v2291_v43  ;;  %v2354_v43 = vld [vmem:[#allocation3 + $0x244] ss:$8 sps:$4 sm:$0xff]  }
  0x8f   : > { %511 = vmatmul.mubr.bf16.vlgmr.msra.gmra.mrb[0].mxu0 %v308_v44  ;;  %v2357_v44 = vld [vmem:[#allocation3 + $0x254] ss:$8 sps:$4 sm:$0xff]  }
  0x90   : > { %684 = vmatpush1.bf16.msra.mxu0 %v2289_v45  ;;  %715 = vmatprep.mubr.bf16.mxu0 %v1980_v46  ;;  %v2355_v45 = vld [vmem:[#allocation3 + $0x250] ss:$8 sps:$4 sm:$0xff]   ;;  %v2360_v46 = vld [vmem:[#allocation3 + $0x264] ss:$8 sps:$4 sm:$0xff]  }
  0x91   : > { %685 = vmatprep.subr.bf16.mxu0 %v2295_v47  ;;  %v2358_v47 = vld [vmem:[#allocation3 + $0x260] ss:$8 sps:$4 sm:$0xff]  }
  0x94   : > { %686 = vmatpush1.bf16.msra.mxu0 %v2293_v48  ;;  %v2363_v48 = vld [vmem:[#allocation3 + $0x274] ss:$8 sps:$4 sm:$0xff]  }
  0x95   : > { %687 = vmatprep.subr.bf16.mxu0 %v2298_v51  ;;  %v2364_v51 = vld [vmem:[#allocation3 + $0x280] ss:$8 sps:$4 sm:$0xff]  }
  0x98   : > { %688 = vmatpush1.bf16.msra.mxu0 %v2296_v55  ;;  %v2370_v55 = vld [vmem:[#allocation3 + $0x2a0] ss:$8 sps:$4 sm:$0xff]  }
  0x99   : > { %689 = vmatprep.subr.bf16.mxu0 %v2301_v56  ;;  %v2375_v56 = vld [vmem:[#allocation3 + $0x2b4] ss:$8 sps:$4 sm:$0xff]  }
  0x9c   : > { %690 = vmatpush1.bf16.msra.mxu0 %v2299_v59  ;;  %v2376_v59 = vld [vmem:[#allocation3 + $0x2c0] ss:$8 sps:$4 sm:$0xff]  }
  0x9d   : > { %691 = vmatprep.subr.bf16.mxu0 %v2304_v60  ;;  %v2381_v60 = vld [vmem:[#allocation3 + $0x2d4] ss:$8 sps:$4 sm:$0xff]  }
  0xa0   : > { %692 = vmatpush1.bf16.msra.mxu0 %v2302_v63  ;;  %v2382_v63 = vld [vmem:[#allocation3 + $0x2e0] ss:$8 sps:$4 sm:$0xff]  }
  0xa1   : > { %693 = vmatprep.subr.bf16.mxu0 %v2307_v0  ;;  %v2387_v0 = vld [vmem:[#allocation3 + $0x2f4] ss:$8 sps:$4 sm:$0xff]  }
  0xa4   : > { %694 = vmatpush1.bf16.msra.mxu0 %v2305_v3  ;;  %v763_v3 = vrot.slane %v2013_v1, 1 }
  0xa5   : > { %695 = vmatprep.subr.bf16.mxu0 %v2310_v4  ;;  %v2414_v4 = vld [vmem:[#allocation6 + $0x184] ss:$8 sps:$4 sm:$0xff]  }
  0xa6   : > { %1307 = vmatprep.subr.bf16.mxu1 %v2414_v4  ;;  %v2444_v4 = vld [vmem:[#allocation6 + $0x20] ss:$8 sps:$4 sm:$0xff]  }
  0xa7   : > { %1308 = vmatpush1.bf16.msra.mxu1 %v2416_v5  ;;  %v2449_v5 = vld [vmem:[#allocation6 + $0x34] ss:$8 sps:$4 sm:$0xff]  }
  0xa8   : > { %696 = vmatpush1.bf16.msra.mxu0 %v2308_v7  ;;  %v2419_v7 = vld [vmem:[#allocation6 + $0x190] ss:$8 sps:$4 sm:$0xff]   ;;  %1309 = vmatprep.subr.bf16.mxu1 %v2417_v6 }
  0xa9   : > { %697 = vmatprep.subr.bf16.mxu0 %v2313_v8  ;;  %v2668_v8 = vmov 0   ;;  %v2447_v6 = vld [vmem:[#allocation6 + $0x30] ss:$8 sps:$4 sm:$0xff]  }
  0xaa   : > { %1002 = vst [vmem:[#allocation2 + $0x8] sm:$0x11] %v2668_v8  ;;  %v2450_v8 = vld [vmem:[#allocation6 + $0x40] ss:$8 sps:$4 sm:$0xff]  }
  0xab   : > { %1310 = vmatpush1.bf16.msra.mxu1 %v2419_v7  ;;  %v2452_v7 = vld [vmem:[#allocation6 + $0x44] ss:$8 sps:$4 sm:$0xff]  }
  0xac   : > { %698 = vmatpush1.bf16.msra.mxu0 %v2311_v11  ;;  %1311 = vmatprep.subr.bf16.mxu1 %v2420_v9  ;;  %v2425_v11 = vld [vmem:[#allocation6 + $0x1b0] ss:$8 sps:$4 sm:$0xff]   ;;  %v2455_v9 = vld [vmem:[#allocation6 + $0x54] ss:$8 sps:$4 sm:$0xff]  }
  0xad   : > { %699 = vmatprep.subr.bf16.mxu0 %v2316_v12  ;;  %v2426_v12 = vld [vmem:[#allocation6 + $0x1c4] ss:$8 sps:$4 sm:$0xff]  }
  0xaf   : > { %1312 = vmatpush1.bf16.msra.mxu1 %v2422_v10  ;;  %v2453_v10 = vld [vmem:[#allocation6 + $0x50] ss:$8 sps:$4 sm:$0xff]  }
  0xb0   : > { %700 = vmatpush1.bf16.msra.mxu0 %v2314_v16  ;;  %1313 = vmatprep.subr.bf16.mxu1 %v2423_v14  ;;  %v2429_v16 = vld [vmem:[#allocation6 + $0x1d4] ss:$8 sps:$4 sm:$0xff]   ;;  %v2458_v14 = vld [vmem:[#allocation6 + $0x64] ss:$8 sps:$4 sm:$0xff]  }
  0xb1   : > { %701 = vmatprep.subr.bf16.mxu0 %v2319_v17  ;;  %v2431_v17 = vld [vmem:[#allocation6 + $0x1d0] ss:$8 sps:$4 sm:$0xff]  }
  0xb3   : > { %1314 = vmatpush1.bf16.msra.mxu1 %v2425_v11  ;;  %v2456_v11 = vld [vmem:[#allocation6 + $0x60] ss:$8 sps:$4 sm:$0xff]  }
  0xb4   : > { %702 = vmatpush1.bf16.msra.mxu0 %v2317_v18  ;;  %1315 = vmatprep.subr.bf16.mxu1 %v2426_v12  ;;  %v2432_v18 = vld [vmem:[#allocation6 + $0x1e4] ss:$8 sps:$4 sm:$0xff]   ;;  %v2461_v12 = vld [vmem:[#allocation6 + $0x74] ss:$8 sps:$4 sm:$0xff]  }
  0xb5   : > { %703 = vmatprep.subr.bf16.mxu0 %v2322_v19  ;;  %v2434_v19 = vld [vmem:[#allocation6 + $0x1e0] ss:$8 sps:$4 sm:$0xff]  }
  0xb7   : > { %1316 = vmatpush1.bf16.msra.mxu1 %v2428_v15  ;;  %v2459_v15 = vld [vmem:[#allocation6 + $0x70] ss:$8 sps:$4 sm:$0xff]  }
  0xb8   : > { %704 = vmatpush1.bf16.msra.mxu0 %v2320_v20  ;;  %1317 = vmatprep.subr.bf16.mxu1 %v2429_v16  ;;  %v2435_v20 = vld [vmem:[#allocation6 + $0x1f4] ss:$8 sps:$4 sm:$0xff]   ;;  %v2464_v16 = vld [vmem:[#allocation6 + $0x84] ss:$8 sps:$4 sm:$0xff]  }
  0xb9   : > { %705 = vmatprep.subr.bf16.mxu0 %v2325_v21  ;;  %v2437_v21 = vld [vmem:[#allocation6 + $0x1f0] ss:$8 sps:$4 sm:$0xff]  }
  0xbb   : > { %1318 = vmatpush1.bf16.msra.mxu1 %v2431_v17  ;;  %v2462_v17 = vld [vmem:[#allocation6 + $0x80] ss:$8 sps:$4 sm:$0xff]  }
  0xbc   : > { %706 = vmatpush1.bf16.msra.mxu0 %v2323_v22  ;;  %1319 = vmatprep.subr.bf16.mxu1 %v2432_v18  ;;  %v2440_v22 = vld [vmem:[#allocation6 + $0x4] ss:$8 sps:$4 sm:$0xff]   ;;  %v2467_v18 = vld [vmem:[#allocation6 + $0x94] ss:$8 sps:$4 sm:$0xff]  }
  0xbd   : > { %707 = vmatprep.subr.bf16.mxu0 %v2328_v23  ;;  %v972_v23 = vlaneseq }
  0xbf   : > { %1320 = vmatpush1.bf16.msra.mxu1 %v2434_v19  ;;  %v2465_v19 = vld [vmem:[#allocation6 + $0x90] ss:$8 sps:$4 sm:$0xff]  }
  0xc0   : > { %708 = vmatpush1.bf16.msra.mxu0 %v2326_v24  ;;  %1321 = vmatprep.subr.bf16.mxu1 %v2435_v20  ;;  %v973_v24 = vshrl.u32 %v972_v23, 7  ;;  %v2470_v20 = vld [vmem:[#allocation6 + $0xa4] ss:$8 sps:$4 sm:$0xff]   ;;  %v2471_v23 = vld [vmem:[#allocation6 + $0xb0] ss:$8 sps:$4 sm:$0xff]  }
  0xc1   : > { %709 = vmatprep.subr.bf16.mxu0 %v2331_v25 }
  0xc2   : > { %v2843_v25 = vsub.s32 0, %v973_v24 }
  0xc3   : > { %1322 = vmatpush1.bf16.msra.mxu1 %v2437_v21  ;;  %v2468_v21 = vld [vmem:[#allocation6 + $0xa0] ss:$8 sps:$4 sm:$0xff]  }
  0xc4   : > { %710 = vmatpush1.bf16.msra.mxu0 %v2329_v26  ;;  %1496 = vmatprep.subr.bf16.mxu1 %v2440_v22  ;;  %v970_v26 = vld [vmem:[%s2948_s3] ss:$4 sm:$0x3] }
  0xc5   : > { %711 = vmatprep.subr.bf16.mxu0 %v2334_v27  ;;  %v2848_v27 = vsub.s32 1, %v973_v24  ;;  %v2473_v22 = vld [vmem:[#allocation6 + $0xb4] ss:$8 sps:$4 sm:$0xff]   ;;  %v2476_v24 = vld [vmem:[#allocation6 + $0xc4] ss:$8 sps:$4 sm:$0xff]  }
  0xc7   : > { %v979_v30 = vrot.slane %v970_v26, %v2848_v27 }
  0xc8   : > { %712 = vmatpush1.bf16.msra.mxu0 %v2332_v28  ;;  %v2047_v28 = vld [vmem:[%s2948_s3 + $0x1] ss:$4 sm:$0x3] }
  0xc9   : > { %713 = vmatprep.subr.bf16.mxu0 %v2337_v29  ;;  %v975_v29 = vrot.slane %v970_v26, %v2843_v25  ;;  %v2474_v26 = vld [vmem:[#allocation6 + $0xc0] ss:$8 sps:$4 sm:$0xff]  }
  0xcc   : > { %714 = vmatpush1.bf16.msra.mxu0 %v2335_v31  ;;  %v990_v31 = vrot.slane %v2047_v28, %v2843_v25 }
  0xcd   : > { %927 = vmatprep.subr.bf16.mxu0 %v2341_v33  ;;  %v994_v33 = vrot.slane %v2047_v28, %v2848_v27  ;;  %v2479_v28 = vld [vmem:[#allocation6 + $0xd4] ss:$8 sps:$4 sm:$0xff]  }
  0xcf   : > { %716 = vmatmul.mubr.bf16.vlgmr.msra.gmra.mrb[0].mxu0 %v1979_v34 }
  0xd0   : > { %928 = vmatpush1.bf16.msra.mxu0 %v2339_v35  ;;  %959 = vmatprep.mubr.bf16.mxu0 %v764_v36 }
  0xd1   : > { %929 = vmatprep.subr.bf16.mxu0 %v2345_v37 }
  0xd4   : > { %930 = vmatpush1.bf16.msra.mxu0 %v2343_v38 }
  0xd5   : > { %931 = vmatprep.subr.bf16.mxu0 %v2348_v39 }
  0xd8   : > { %932 = vmatpush1.bf16.msra.mxu0 %v2346_v40 }
  0xd9   : > { %933 = vmatprep.subr.bf16.mxu0 %v2351_v41 }
  0xdc   : > { %934 = vmatpush1.bf16.msra.mxu0 %v2349_v42 }
  0xdd   : > { %935 = vmatprep.subr.bf16.mxu0 %v2354_v43  ;;  %v2494_v43 = vld [vmem:[#allocation6 + $0x220] ss:$8 sps:$4 sm:$0xff]  }
  0xe0   : > { %936 = vmatpush1.bf16.msra.mxu0 %v2352_v13 }
  0xe1   : > { %937 = vmatprep.subr.bf16.mxu0 %v2357_v44 }
  0xe4   : > { %938 = vmatpush1.bf16.msra.mxu0 %v2355_v45 }
  0xe5   : > { %939 = vmatprep.subr.bf16.mxu0 %v2360_v46 }
  0xe8   : > { %940 = vmatpush1.bf16.msra.mxu0 %v2358_v47  ;;  %v1037_v47 = vld [vmem:[#allocation2 + $0x8] sm:$0x11] }
  0xe9   : > { %941 = vmatprep.subr.bf16.mxu0 %v2363_v48 }
  0xec   : > { %942 = vmatpush1.bf16.msra.mxu0 %v2361_v49 }
  0xed   : > { %943 = vmatprep.subr.bf16.mxu0 %v2366_v50 }
  0xf0   : > { %944 = vmatpush1.bf16.msra.mxu0 %v2364_v51 }
  0xf1   : > { %945 = vmatprep.subr.bf16.mxu0 %v2369_v52 }
  0xf4   : > { %946 = vmatpush1.bf16.msra.mxu0 %v2367_v53 }
  0xf5   : > { %947 = vmatprep.subr.bf16.mxu0 %v2372_v54 }
  0xf8   : > { %948 = vmatpush1.bf16.msra.mxu0 %v2370_v55 }
  0xf9   : > { %949 = vmatprep.subr.bf16.mxu0 %v2375_v56 }
  0xfc   : > { %950 = vmatpush1.bf16.msra.mxu0 %v2373_v57 }
  0xfd   : > { %951 = vmatprep.subr.bf16.mxu0 %v2378_v58 }
 0x100   : > { %952 = vmatpush1.bf16.msra.mxu0 %v2376_v59 }
 0x101   : > { %953 = vmatprep.subr.bf16.mxu0 %v2381_v60 }
 0x104   : > { %954 = vmatpush1.bf16.msra.mxu0 %v2379_v61 }
 0x105   : > { %955 = vmatprep.subr.bf16.mxu0 %v2384_v62  ;;  %v2438_v62 = vld [vmem:[#allocation6] ss:$8 sps:$4 sm:$0xff]  }
 0x108   : > { %956 = vmatpush1.bf16.msra.mxu0 %v2382_v63 }
 0x109   : > { %957 = vmatprep.subr.bf16.mxu0 %v2387_v0  ;;  %v2443_v0 = vld [vmem:[#allocation6 + $0x14] ss:$8 sps:$4 sm:$0xff]  }
 0x10c   : > { %958 = vmatpush1.bf16.msra.mxu0 %v2385_v2  ;;  %v2441_v2 = vld [vmem:[#allocation6 + $0x10] ss:$8 sps:$4 sm:$0xff]  }
 0x10f   : > { %960 = vmatmul.mubr.bf16.vlgmr.msra.gmra.mrb[0].mxu0 %v763_v3  ;;  %v2446_v3 = vld [vmem:[#allocation6 + $0x24] ss:$8 sps:$4 sm:$0xff]  }
 0x1e2   : > { %v961_v32 = vpop.f32.mrb[0].mxu0 }
 0x1e3   : > { %v982_v34 = vmul.f32 %v975_v29, %v961_v32  ;;  %v963_v35 = vpop.f32.mrb[1].mxu0  ;;  %v2477_v29 = vld [vmem:[#allocation6 + $0xd0] ss:$8 sps:$4 sm:$0xff]   ;;  %v2485_v32 = vld [vmem:[#allocation6 + $0xf4] ss:$8 sps:$4 sm:$0xff]  }
 0x1e4   : > { %v983_v36 = vmul.f32 %v979_v30, %v963_v35  ;;  %v965_v37 = vpop.f32.mrb[2].mxu0  ;;  %v2482_v30 = vld [vmem:[#allocation6 + $0xe4] ss:$8 sps:$4 sm:$0xff]  }
 0x1e5   : > { %v997_v38 = vadd.f32 %v990_v31, %v982_v34  ;;  %v966_v39 = vpop.f32.mrb[3].mxu0  ;;  %v2480_v31 = vld [vmem:[#allocation6 + $0xe0] ss:$8 sps:$4 sm:$0xff]   ;;  %v2483_v34 = vld [vmem:[#allocation6 + $0xf0] ss:$8 sps:$4 sm:$0xff]  }
 0x1e6   : > { %v998_v40 = vadd.f32 %v994_v33, %v983_v36  ;;  %v2488_v35 = vld [vmem:[#allocation6 + $0x204] ss:$8 sps:$4 sm:$0xff]   ;;  %v2486_v37 = vld [vmem:[#allocation6 + $0x200] ss:$8 sps:$4 sm:$0xff]   ;;  %v2493_v39 = vld [vmem:[#allocation6 + $0x214] ss:$8 sps:$4 sm:$0xff]  }
 0x1e7   : > { %v999_v41 = vmax.f32 %v997_v38, 0.0 }
 0x1e8   : > { %v1000_v42 = vmax.f32 %v998_v40, 0.0 }
 0x1ea   : > { %v2159_v13 = vpack.c.bf16 %v1000_v42, %v999_v41  ;;  %v2491_v41 = vld [vmem:[#allocation6 + $0x210] ss:$8 sps:$4 sm:$0xff]   ;;  %v2496_v42 = vld [vmem:[#allocation6 + $0x224] ss:$8 sps:$4 sm:$0xff]  }
 0x1ec   : > { %v1011_v44 = vshrl.u32 %v2159_v13, 16  ;;  %v1014_v46 = vshll.u32 %v2159_v13, 16  ;;  %v2499_v13 = vld [vmem:[#allocation6 + $0x234] ss:$8 sps:$4 sm:$0xff]  }
 0x1ee   : > { %v1013_v45 = vrot.slane %v1011_v44, 7  ;;  %v2497_v44 = vld [vmem:[#allocation6 + $0x230] ss:$8 sps:$4 sm:$0xff]  }
 0x1f0   : > { %v1016_v48 = vor.u32 %v1014_v46, %v1013_v45  ;;  %v1017_v49 = vrot.slane %v1013_v45, 4  ;;  %v2502_v45 = vld [vmem:[#allocation6 + $0x244] ss:$8 sps:$4 sm:$0xff]   ;;  %v2500_v46 = vld [vmem:[#allocation6 + $0x240] ss:$8 sps:$4 sm:$0xff]  }
 0x1f2   : > { %v2863_v50 = vsel %vm1026_vm12, %v1016_v48, 0  ;;  %v1038_v51 = vsel %vm1036_vm13, %v1017_v49, %v1037_v47  ;;  %v2505_v47 = vld [vmem:[#allocation6 + $0x254] ss:$8 sps:$4 sm:$0xff]   ;;  %v2503_v48 = vld [vmem:[#allocation6 + $0x250] ss:$8 sps:$4 sm:$0xff]  }
 0x1f3   : > { %1029 = vst [vmem:[#allocation2] sm:$0xff] %v2863_v50  ;;  %1039 = vst [vmem:[#allocation2 + $0x8] sm:$0x11] %v1038_v51  ;;  %v2084_v1 = vcombine.high %v2863_v50, %v2863_v50  ;;  %v2083_v38 = vcombine.low %v2863_v50, %v2863_v50  ;;  %v2508_v49 = vld [vmem:[#allocation6 + $0x264] ss:$8 sps:$4 sm:$0xff]  }
 0x1f4   : > { %v2511_v51 = vld [vmem:[#allocation6 + $0x274] ss:$8 sps:$4 sm:$0xff]  }
 0x1fa   : > { %v2866_v52 = vld [vmem:[#allocation2 + $0x8] sm:$0x11]  ;;  %v2874_v33 = vld [vmem:[#allocation2] sm:$0xee] }
 0x1fb   : > { %v2050_v53 = vcombine.high %v2863_v50, %v2866_v52  ;;  %v2049_v54 = vcombine.low %v2863_v50, %v2866_v52  ;;  %v2118_v36 = vcombine.high %v2874_v33, %v2866_v52  ;;  %v2506_v50 = vld [vmem:[#allocation6 + $0x260] ss:$8 sps:$4 sm:$0xff]  }
 0x1fd   : > { %v1125_v55 = vshll.u32 %v2050_v53, 16  ;;  %v1118_v56 = vshll.u32 %v2049_v54, 16  ;;  %v1123_v57 = vshrl.u32 %v2050_v53, 16  ;;  %v1116_v59 = vshrl.u32 %v2049_v54, 16  ;;  %v2509_v53 = vld [vmem:[#allocation6 + $0x270] ss:$8 sps:$4 sm:$0xff]  }
 0x1fe   : > { %v1577_v40 = vrot.slane %v2118_v36, 1  ;;  %v2514_v54 = vld [vmem:[#allocation6 + $0x284] ss:$8 sps:$4 sm:$0xff]  }
 0x1ff   : > { %v1127_v58 = vrot.slane %v1125_v55, 1  ;;  %v1120_v60 = vrot.slane %v1118_v56, 1  ;;  %v2512_v55 = vld [vmem:[#allocation6 + $0x280] ss:$8 sps:$4 sm:$0xff]   ;;  %v2517_v56 = vld [vmem:[#allocation6 + $0x294] ss:$8 sps:$4 sm:$0xff]  }
 0x201   : > { %v1128_v61 = vor.u32 %v1127_v58, %v1123_v57  ;;  %v1121_v63 = vor.u32 %v1120_v60, %v1116_v59  ;;  %v2515_v57 = vld [vmem:[#allocation6 + $0x290] ss:$8 sps:$4 sm:$0xff]   ;;  %v2520_v58 = vld [vmem:[#allocation6 + $0x2a4] ss:$8 sps:$4 sm:$0xff]   ;;  %v2518_v59 = vld [vmem:[#allocation6 + $0x2a0] ss:$8 sps:$4 sm:$0xff]  }
 0x202   : > { %v2523_v60 = vld [vmem:[#allocation6 + $0x2b4] ss:$8 sps:$4 sm:$0xff]  }
 0x203   : > { %1323 = vmatprep.mubr.bf16.mxu1 %v1128_v61  ;;  %v2521_v61 = vld [vmem:[#allocation6 + $0x2b0] ss:$8 sps:$4 sm:$0xff]  }
 0x204   : > { %1324 = vmatmul.mubr.bf16.vlgmr.msra.gmra.mrb[0].mxu1 %v1121_v63  ;;  %v2524_v63 = vld [vmem:[#allocation6 + $0x2c0] ss:$8 sps:$4 sm:$0xff]  }
 0x205   : > { %1497 = vmatpush1.bf16.msra.mxu1 %v2438_v62  ;;  %1528 = vmatprep.mubr.bf16.mxu1 %v2084_v1  ;;  %v2526_v62 = vld [vmem:[#allocation6 + $0x2c4] ss:$8 sps:$4 sm:$0xff]   ;;  %v2527_v1 = vld [vmem:[#allocation6 + $0x2d0] ss:$8 sps:$4 sm:$0xff]  }
 0x206   : > { %1498 = vmatprep.subr.bf16.mxu1 %v2443_v0  ;;  %v2529_v0 = vld [vmem:[#allocation6 + $0x2d4] ss:$8 sps:$4 sm:$0xff]  }
 0x209   : > { %1499 = vmatpush1.bf16.msra.mxu1 %v2441_v2  ;;  %v2532_v2 = vld [vmem:[#allocation6 + $0x2e4] ss:$8 sps:$4 sm:$0xff]  }
 0x20a   : > { %1500 = vmatprep.subr.bf16.mxu1 %v2446_v3  ;;  %v2530_v3 = vld [vmem:[#allocation6 + $0x2e0] ss:$8 sps:$4 sm:$0xff]  }
 0x20d   : > { %1501 = vmatpush1.bf16.msra.mxu1 %v2444_v4  ;;  %v2535_v4 = vld [vmem:[#allocation6 + $0x2f4] ss:$8 sps:$4 sm:$0xff]  }
 0x20e   : > { %1502 = vmatprep.subr.bf16.mxu1 %v2449_v5  ;;  %v2533_v5 = vld [vmem:[#allocation6 + $0x2f0] ss:$8 sps:$4 sm:$0xff]  }
 0x211   : > { %1503 = vmatpush1.bf16.msra.mxu1 %v2447_v6  ;;  %v2117_v6 = vcombine.low %v2874_v33, %v2866_v52 }
 0x212   : > { %1504 = vmatprep.subr.bf16.mxu1 %v2452_v7 }
 0x213   : > { %v1576_v7 = vrot.slane %v2117_v6, 1 }
 0x215   : > { %1505 = vmatpush1.bf16.msra.mxu1 %v2450_v8  ;;  %v1813_v8 = vld [vmem:[%s2820_s22] sm:$0xff] }
 0x216   : > { %1506 = vmatprep.subr.bf16.mxu1 %v2455_v9  ;;  %v1814_v9 = vld [vmem:[%s2820_s22 + $0x8] sm:$0x11]  ;;  %s1839_s22 = scalar_lea.sflag [#allocation5], %s218_s12 }
 0x219   : > { %1507 = vmatpush1.bf16.msra.mxu1 %v2453_v10  ;;  %v2151_v10 = vld [vmem:[%s2948_s3 + $0x2] ss:$4 sm:$0x3] }
 0x21a   : > { %1508 = vmatprep.subr.bf16.mxu1 %v2458_v14  ;;  %v1815_v14 = vunpack.c.l.bf16 %v1813_v8  ;;  %v1789_v52 = vrot.slane %v2151_v10, %v2843_v25 }
 0x21d   : > { %1509 = vmatpush1.bf16.msra.mxu1 %v2456_v11  ;;  %v1817_v11 = vunpack.c.l.bf16 %v1814_v9 }
 0x21e   : > { %1510 = vmatprep.subr.bf16.mxu1 %v2461_v12  ;;  %v1816_v12 = vunpack.c.h.bf16 %v1813_v8 }
 0x221   : > { %1511 = vmatpush1.bf16.msra.mxu1 %v2459_v15  ;;  %v1818_v15 = vunpack.c.h.bf16 %v1814_v9 }
 0x222   : > { %1512 = vmatprep.subr.bf16.mxu1 %v2464_v16  ;;  %v2152_v16 = vld [vmem:[%s2948_s3 + $0x3] ss:$4 sm:$0x3] }
 0x225   : > { %1513 = vmatpush1.bf16.msra.mxu1 %v2462_v17  ;;  %v1824_v17 = vrot.slane %v1815_v14, 1 }
 0x226   : > { %1514 = vmatprep.subr.bf16.mxu1 %v2467_v18  ;;  %v1825_v18 = vrot.slane %v1817_v11, 1 }
 0x229   : > { %1515 = vmatpush1.bf16.msra.mxu1 %v2465_v19  ;;  %v1793_v19 = vrot.slane %v2151_v10, %v2848_v27 }
 0x22a   : > { %1516 = vmatprep.subr.bf16.mxu1 %v2470_v20  ;;  %v1804_v20 = vrot.slane %v2152_v16, %v2843_v25 }
 0x22d   : > { %1517 = vmatpush1.bf16.msra.mxu1 %v2468_v21  ;;  %v1827_v21 = vrot.slane %v1816_v12, 1 }
 0x22e   : > { %1518 = vmatprep.subr.bf16.mxu1 %v2473_v22  ;;  %v1828_v22 = vrot.slane %v1818_v15, 1 }
 0x230   : > { %v1829_v33 = vsel %vm1823_vm14, %v1827_v21, %v1828_v22 }
 0x231   : > { %1519 = vmatpush1.bf16.msra.mxu1 %v2471_v23 }
 0x232   : > { %1520 = vmatprep.subr.bf16.mxu1 %v2476_v24  ;;  %v1808_v24 = vrot.slane %v2152_v16, %v2848_v27 }
 0x235   : > { %1521 = vmatpush1.bf16.msra.mxu1 %v2474_v26 }
 0x236   : > { %1522 = vmatprep.subr.bf16.mxu1 %v2479_v28 }
 0x239   : > { %1523 = vmatpush1.bf16.msra.mxu1 %v2477_v29  ;;  %v1826_v29 = vsel %vm1823_vm14, %v1824_v17, %v1825_v18 }
 0x23a   : > { %1524 = vmatprep.subr.bf16.mxu1 %v2482_v30 }
 0x23d   : > { %1525 = vmatpush1.bf16.msra.mxu1 %v2480_v31 }
 0x23e   : > { %1526 = vmatprep.subr.bf16.mxu1 %v2485_v32 }
 0x241   : > { %1527 = vmatpush1.bf16.msra.mxu1 %v2483_v34 }
 0x242   : > { %1740 = vmatprep.subr.bf16.mxu1 %v2488_v35 }
 0x244   : > { %1529 = vmatmul.mubr.bf16.vlgmr.msra.gmra.mrb[0].mxu1 %v2083_v38 }
 0x245   : > { %1741 = vmatpush1.bf16.msra.mxu1 %v2486_v37  ;;  %1772 = vmatprep.mubr.bf16.mxu1 %v1577_v40 }
 0x246   : > { %1742 = vmatprep.subr.bf16.mxu1 %v2493_v39 }
 0x249   : > { %1743 = vmatpush1.bf16.msra.mxu1 %v2491_v41 }
 0x24a   : > { %1744 = vmatprep.subr.bf16.mxu1 %v2496_v42 }
 0x24d   : > { %1745 = vmatpush1.bf16.msra.mxu1 %v2494_v43 }
 0x24e   : > { %1746 = vmatprep.subr.bf16.mxu1 %v2499_v13 }
 0x251   : > { %1747 = vmatpush1.bf16.msra.mxu1 %v2497_v44 }
 0x252   : > { %1748 = vmatprep.subr.bf16.mxu1 %v2502_v45 }
 0x255   : > { %1749 = vmatpush1.bf16.msra.mxu1 %v2500_v46 }
 0x256   : > { %1750 = vmatprep.subr.bf16.mxu1 %v2505_v47 }
 0x259   : > { %1751 = vmatpush1.bf16.msra.mxu1 %v2503_v48 }
 0x25a   : > { %1752 = vmatprep.subr.bf16.mxu1 %v2508_v49 }
 0x25d   : > { %1753 = vmatpush1.bf16.msra.mxu1 %v2506_v50 }
 0x25e   : > { %1754 = vmatprep.subr.bf16.mxu1 %v2511_v51 }
 0x261   : > { %1755 = vmatpush1.bf16.msra.mxu1 %v2509_v53 }
 0x262   : > { %1756 = vmatprep.subr.bf16.mxu1 %v2514_v54 }
 0x265   : > { %1757 = vmatpush1.bf16.msra.mxu1 %v2512_v55 }
 0x266   : > { %1758 = vmatprep.subr.bf16.mxu1 %v2517_v56 }
 0x269   : > { %1759 = vmatpush1.bf16.msra.mxu1 %v2515_v57 }
 0x26a   : > { %1760 = vmatprep.subr.bf16.mxu1 %v2520_v58 }
 0x26d   : > { %1761 = vmatpush1.bf16.msra.mxu1 %v2518_v59 }
 0x26e   : > { %1762 = vmatprep.subr.bf16.mxu1 %v2523_v60 }
 0x271   : > { %1763 = vmatpush1.bf16.msra.mxu1 %v2521_v61 }
 0x272   : > { %1764 = vmatprep.subr.bf16.mxu1 %v2526_v62 }
 0x275   : > { %1765 = vmatpush1.bf16.msra.mxu1 %v2524_v63 }
 0x276   : > { %1766 = vmatprep.subr.bf16.mxu1 %v2529_v0 }
 0x279   : > { %1767 = vmatpush1.bf16.msra.mxu1 %v2527_v1 }
 0x27a   : > { %1768 = vmatprep.subr.bf16.mxu1 %v2532_v2 }
 0x27d   : > { %1769 = vmatpush1.bf16.msra.mxu1 %v2530_v3 }
 0x27e   : > { %1770 = vmatprep.subr.bf16.mxu1 %v2535_v4 }
 0x281   : > { %1771 = vmatpush1.bf16.msra.mxu1 %v2533_v5 }
 0x284   : > { %1773 = vmatmul.mubr.bf16.vlgmr.msra.gmra.mrb[0].mxu1 %v1576_v7 }
 0x357   : > { %v1774_v23 = vpop.f32.mrb[0].mxu1 }
 0x358   : > { %v1796_v26 = vmul.f32 %v1789_v52, %v1774_v23  ;;  %v1776_v28 = vpop.f32.mrb[1].mxu1 }
 0x359   : > { %v1797_v30 = vmul.f32 %v1793_v19, %v1776_v28  ;;  %v1778_v31 = vpop.f32.mrb[2].mxu1 }
 0x35a   : > { %v1811_v32 = vadd.f32 %v1804_v20, %v1796_v26  ;;  %v1779_v34 = vpop.f32.mrb[3].mxu1 }
 0x35b   : > { %v1812_v25 = vadd.f32 %v1808_v24, %v1797_v30 }
 0x35c   : > { %v1832_v35 = vadd.f32 %v1826_v29, %v1811_v32 }
 0x35d   : > { %v1833_v36 = vadd.f32 %v1829_v33, %v1812_v25 }
 0x35e   : > { %v1834_v37 = vmax.f32 %v1832_v35, 0.0 }
 0x35f   : > { %v1835_v38 = vmax.f32 %v1833_v36, 0.0 }
 0x360   : > { %1836 = vst [vmem:[%s220_s14] sm:$0xff] %v1834_v37 }
 0x361   : > { %1837 = vst [vmem:[%s220_s14 + $0x8] sm:$0xff] %v1835_v38 }
 0x362   : > { %2605 = shalt.err (!%p2602_p11)
}
 0x363   : > { %s2606_s7 = scalar_lea.hbm %s2901_s20, 256  ;;  %s2610_s10 = scalar_lea.hbm %s2949_s4, 512 }
 0x364   : > { %p2607_p13 = scmp.ne.s32.totalorder %s2901_s20, %s2606_s7  ;;  %p2611_p6 = scmp.lt.u32.totalorder %s2901_s20, %s2949_s4 }
 0x365   : > { %p2612_p9 = scmp.lt.u32.totalorder %s2610_s10, %s2606_s7  ;;  %p2614_p10 = scmp.lt.u32.totalorder %s2606_s7, %s2901_s20 }
 0x366   : > { %p2608_p5 = pnand %p2607_p13, %p2964_p1 }
 0x367   : > { %p2613_p12 = por %p2612_p9, %p2611_p6 }
 0x368   : > { %p2609_p0 = pneg %p2608_p5 }
 0x369   : > { %p2615_p2 = por %p2614_p10, %p2613_p12 }
 0x36b   : > { %p2616_p3 = pnand %p2615_p2, %p2609_p0 }
 0x36d   : > { %2619 = shalt.err (!%p2616_p3)
}
 0x36e   : > { %2185 = dma.vmem_to_hbm [thread:$0]  (%p2964_p1), %s2903_s27, 256, %s2901_s20, %s1839_s22  }
 0x36f PF: > { %p2202_p4 = scmp.ge.s32.totalorder %s2662_s18, 2  ;;  %s1865_s29 = sand.u32 1, %s2650_s15  }
 0x370   : > { %p2965_p7 = scmp.ne.s32.totalorder %s2954_s26, 0  ;;  %s1866_s13 = scalar_lea.sflag [#allocation5], %s1865_s29 }
 0x372   : > { %p2195_p8 = pnand %p2202_p4, %p2965_p7 }
 0x374   : > { %2645 = dma.done.wait (!%p2195_p8), %s1866_s13, 256  }
 0x375   : > { %2647 = vsyncadd (!%p2195_p8), %s1866_s13, 4294967040  ;;  %p16_p11 = scmp.ge.s32.totalorder %s2720_s21, 4   ;;  %s2966_s15 = smov %s2654_s16 }
 0x376   : > { %s2967_s16 = smov %s2658_s17  ;;  %s2968_s17 = smov %s2731_s24 }
 0x377   : > { %s2969_s18 = smov %s2720_s21  ;;  %18 = sbr.rel (!%p16_p11) target bundleno = 5 (0x5), region = 87 }
 0x37e   :  { %1871 = vsyncpa [#allocation4], 1 }
 0x37f   :  { %1873 = vsyncpa [#allocation4 + $0x1], 1 }
 0x380   :  { %1874 = vsyncpa [#allocation7], 1 }
 0x381   :  { %1875 = vsyncpa [#allocation5], 1 }
 0x382   :  { %1877 = vsyncpa [#allocation5 + $0x1], 1 }

</bundles_post_ra>
